<compile_context>
chip_gen: v5e
topology: v5e:2x2
jax: 0.10.0
libtpu: 0.0.40
codegen_flags: <defaults>
</compile_context>

<pallas_src>
import functools

import jax
import jax.numpy as jnp
from jax import lax
from jax.experimental import pallas as pl
from jax.experimental.pallas import tpu as pltpu


_RESIDENT_VMEM_BUDGET = 40 << 20   # conservative vs. v7x 64 MiB physical VMEM
_VMEM_LIMIT_CAP = 56 << 20         # never request more than this scoped VMEM
_TANH_CACHE_BUDGET = 16 << 20      # max size of the tanh(x) row-panel cache


def _round_up(x: int, m: int) -> int:
    return ((x + m - 1) // m) * m


def _pick_tile(dim: int, base: int, max_tile: int) -> int:
    """Tile size: multiple of `base`, <= max_tile, and (when possible) an
    exact divisor of round_up(dim, base) so padding waste stays < base."""
    max_tile = max(max_tile, base)
    padded = _round_up(dim, base)
    if padded <= max_tile:
        return padded
    m = padded // base
    best = base
    for d in range(m, 0, -1):
        if m % d == 0 and d * base <= max_tile:
            best = d * base
            break
    if best < 256 and best * 4 < max_tile:
        # Pathological (near-prime) dim: prefer a big tile, accept padding.
        return max_tile
    return best


def _vmem_limit(est_bytes: int) -> int:
    return int(min(max(est_bytes + (8 << 20), 32 << 20), _VMEM_LIMIT_CAP))


def _maybe_pad(a, target_shape):
    pads = tuple((0, t - s) for s, t in zip(a.shape, target_shape))
    if all(p == (0, 0) for p in pads):
        return a
    return jnp.pad(a, pads)


# ---------------------------------------------------------------------------
# Kernels
# ---------------------------------------------------------------------------
def _make_resident_kernel(fn_inside: bool):
    """W and bias fully VMEM-resident; one (tm, N) output row-panel per step."""
    def kernel(x_ref, w_ref, b_ref, o_ref):
        x = x_ref[...]
        if fn_inside:
            # fn applied to the input exactly once; cast back so bf16 inputs
            # keep the MXU on its native low-precision fast path.
            x = jnp.tanh(x.astype(jnp.float32)).astype(x_ref.dtype)
        # x: (tm, Kp), w: (Np, Kp) [PyTorch Linear (out, in) layout].
        # Contract lhs dim 1 with rhs dim 1 -> (tm, Np); no materialized w.T.
        y = lax.dot_general(
            x, w_ref[...],
            dimension_numbers=(((1,), (1,)), ((), ())),
            preferred_element_type=jnp.float32,
        )
        y = y + b_ref[...].astype(jnp.float32)
        if not fn_inside:
            y = jnp.tanh(y)
        o_ref[...] = y.astype(o_ref.dtype)
    return kernel


def _make_tiled_kernel(fn_inside: bool, cache_tanh: bool, tk: int):
    """(i, j, k) tiled fallback with f32 accumulator and optional tanh cache."""
    def kernel(x_ref, w_ref, b_ref, o_ref, acc_ref, *maybe_xt):
        j = pl.program_id(1)
        k = pl.program_id(2)

        @pl.when(k == 0)
        def _():
            acc_ref[...] = jnp.zeros_like(acc_ref)

        if fn_inside and cache_tanh:
            xt_ref = maybe_xt[0]
            off = pl.multiple_of(k * tk, 128)

            @pl.when(j == 0)
            def _():
                xt_ref[:, pl.ds(off, tk)] = jnp.tanh(
                    x_ref[...].astype(jnp.float32)).astype(xt_ref.dtype)

            x = xt_ref[:, pl.ds(off, tk)]
        elif fn_inside:
            x = jnp.tanh(x_ref[...].astype(jnp.float32)).astype(x_ref.dtype)
        else:
            x = x_ref[...]

        # x: (tm, tk), w: (tn, tk); contract dim 1 with dim 1 -> (tm, tn).
        acc_ref[...] += lax.dot_general(
            x, w_ref[...],
            dimension_numbers=(((1,), (1,)), ((), ())),
            preferred_element_type=jnp.float32,
        )

        @pl.when(k == pl.num_programs(2) - 1)
        def _():
            y = acc_ref[...] + b_ref[...].astype(jnp.float32)
            if not fn_inside:
                y = jnp.tanh(y)
            o_ref[...] = y.astype(o_ref.dtype)
    return kernel


# ---------------------------------------------------------------------------
# Wrapper
# ---------------------------------------------------------------------------
@functools.partial(
    jax.jit, static_argnames=("fn_inside", "tm", "tn", "tk", "force_tiled"))
def forward_wrapper(x, w, b, *, fn_inside: bool = False,
                    tm: int = 512, tn: int = 512, tk: int = 512,
                    force_tiled: bool = False):
    """Fused Linear(+bias) / tanh in either order.

    x: [T, K]  (tokens, hidden_in)
    w: [N, K]  (hidden_out, hidden_in)  -- PyTorch nn.Linear layout
    b: [1, N]
    returns [T, N] in x.dtype
    """
    T, K = x.shape
    N, K2 = w.shape
    assert K == K2 and b.shape == (1, N)

    xb = jnp.dtype(x.dtype).itemsize
    wb = jnp.dtype(w.dtype).itemsize
    ob = xb

    Np = _round_up(N, 128)
    Kp = _round_up(K, 128)

    # ---- resident-W fast path --------------------------------------------
    resident_tm = None
    resident_est = 0
    if not force_tiled:
        for cand in (512, 256, 128, 64, 32, 16, 8):
            tm_c = min(cand, _round_up(T, 8))
            est = (2 * Np * Kp * wb        # W (worst case: double-buffered)
                   + 2 * Np * 4            # bias
                   + 2 * tm_c * Kp * xb    # x row-panel tiles (double-buffered)
                   + 2 * tm_c * Np * ob)   # out row-panel tiles
            if est <= _RESIDENT_VMEM_BUDGET:
                resident_tm, resident_est = tm_c, est
                break

    if resident_tm is not None:
        tm_r = resident_tm
        Tp = _round_up(T, tm_r)
        # Short-sequence megacore: make sure the single 'parallel' axis has
        # >= 2 blocks so both v7x TensorCores get work.
        if Tp // tm_r == 1 and Tp >= 16 and Tp % 16 == 0:
            tm_r = Tp // 2

        xp = _maybe_pad(x, (Tp, Kp))
        wp = _maybe_pad(w, (Np, Kp))
        bp = _maybe_pad(b, (1, Np))

        out = pl.pallas_call(
            _make_resident_kernel(fn_inside),
            out_shape=jax.ShapeDtypeStruct((Tp, Np), x.dtype),
            grid_spec=pltpu.PrefetchScalarGridSpec(
                num_scalar_prefetch=0,
                grid=(Tp // tm_r,),
                in_specs=[
                    pl.BlockSpec((tm_r, Kp), lambda i: (i, 0)),  # x row-panel
                    pl.BlockSpec((Np, Kp), lambda i: (0, 0)),    # W (resident)
                    pl.BlockSpec((1, Np), lambda i: (0, 0)),     # bias
                ],
                out_specs=pl.BlockSpec((tm_r, Np), lambda i: (i, 0)),
            ),
            compiler_params=pltpu.CompilerParams(
                dimension_semantics=("parallel",),
                vmem_limit_bytes=_vmem_limit(resident_est),
            ),
        )(xp, wp, bp)

        if Tp == T and Np == N:
            return out
        return out[:T, :N]

    # ---- tiled (i, j, k) fallback ------------------------------------------
    tn_t = _pick_tile(N, 128, tn)
    tk_t = _pick_tile(K, 128, tk)
    tm_t = min(tm, _round_up(T, 8))
    Tp = _round_up(T, tm_t)
    Np_t = _round_up(N, tn_t)
    Kp_t = _round_up(K, tk_t)

    cache_tanh = bool(fn_inside) and (tm_t * Kp_t * xb <= _TANH_CACHE_BUDGET)

    est = (2 * (tm_t * tk_t * xb + tn_t * tk_t * wb + tm_t * tn_t * ob)
           + tm_t * tn_t * 4
           + (tm_t * Kp_t * xb if cache_tanh else 0))

    xp = _maybe_pad(x, (Tp, Kp_t))
    wp = _maybe_pad(w, (Np_t, Kp_t))
    bp = _maybe_pad(b, (1, Np_t))

    scratch = [pltpu.VMEM((tm_t, tn_t), jnp.float32)]
    if cache_tanh:
        scratch.append(pltpu.VMEM((tm_t, Kp_t), x.dtype))

    # The tanh cache is filled on the j==0 sweep, so j must execute in order
    # on one core -> mark it "arbitrary" in that case.
    j_sem = "arbitrary" if cache_tanh else "parallel"

    out = pl.pallas_call(
        _make_tiled_kernel(fn_inside, cache_tanh, tk_t),
        out_shape=jax.ShapeDtypeStruct((Tp, Np_t), x.dtype),
        grid_spec=pltpu.PrefetchScalarGridSpec(
            num_scalar_prefetch=0,
            grid=(Tp // tm_t, Np_t // tn_t, Kp_t // tk_t),
            in_specs=[
                pl.BlockSpec((tm_t, tk_t), lambda i, j, k: (i, k)),  # x tile
                pl.BlockSpec((tn_t, tk_t), lambda i, j, k: (j, k)),  # w tile
                pl.BlockSpec((1, tn_t), lambda i, j, k: (0, j)),     # bias
            ],
            out_specs=pl.BlockSpec((tm_t, tn_t), lambda i, j, k: (i, j)),
            scratch_shapes=scratch,
        ),
        compiler_params=pltpu.CompilerParams(
            dimension_semantics=("parallel", j_sem, "arbitrary"),
            vmem_limit_bytes=_vmem_limit(est),
        ),
    )(xp, wp, bp)

    if Tp == T and Np_t == N:
        return out
    return out[:T, :N]


# ---------------------------------------------------------------------------
# Reference + checks
# ---------------------------------------------------------------------------
def _reference(x, w, b, *, fn_inside: bool):
    xf = x.astype(jnp.float32)
    wf = w.astype(jnp.float32)
    bf = b.astype(jnp.float32)
    if fn_inside:
        return jnp.tanh(xf) @ wf.T + bf
    return jnp.tanh(xf @ wf.T + bf)


if __name__ == "__main__":
    key = jax.random.PRNGKey(0)

    # --- primary demo: small shapes implied by the wrapped Linear module ---
    batch, seq, hidden = 2, 8, 32
    kx, kw, kb = jax.random.split(key, 3)
    x = jax.random.normal(kx, (batch, seq, hidden), dtype=jnp.float32)
    w = jax.random.normal(kw, (hidden, hidden), dtype=jnp.float32) * 0.1
    b = jax.random.normal(kb, (1, hidden), dtype=jnp.float32) * 0.1

    x2d = x.reshape(batch * seq, hidden)      # glue reshape outside the kernel

    # Resident-W fast path, f32, both orderings.
    for fi in (False, True):
        out = forward_wrapper(x2d, w, b, fn_inside=fi)
        jax.block_until_ready(out)
        ref = _reference(x2d, w, b, fn_inside=fi)
        assert jnp.allclose(out, ref, atol=1e-4, rtol=1e-4), f"f32 fi={fi}"

    _ = forward_wrapper(x2d, w, b, fn_inside=False).reshape(batch, seq, hidden)

    # bf16 path (tanh in f32, downcast before the MXU, bf16 output cast).
    xb_ = x2d.astype(jnp.bfloat16)
    wb_ = w.astype(jnp.bfloat16)
    bb_ = b.astype(jnp.bfloat16)
    for fi in (False, True):
        out = forward_wrapper(xb_, wb_, bb_, fn_inside=fi)
        jax.block_until_ready(out)
        ref = _reference(xb_, wb_, bb_, fn_inside=fi)
        assert jnp.allclose(out.astype(jnp.float32), ref,
                            atol=5e-2, rtol=5e-2), f"bf16 fi={fi}"

    # --- tiled fallback: forced, multi-block (i, j, k) + tanh cache --------
    T2, H2 = 192, 256
    k2x, k2w, k2b = jax.random.split(jax.random.PRNGKey(1), 3)
    x2 = jax.random.normal(k2x, (T2, H2), dtype=jnp.float32)
    w2 = jax.random.normal(k2w, (H2, H2), dtype=jnp.float32) * 0.05
    b2 = jax.random.normal(k2b, (1, H2), dtype=jnp.float32) * 0.05
    for fi in (False, True):
        out = forward_wrapper(x2, w2, b2, fn_inside=fi,
                              tm=64, tn=128, tk=128, force_tiled=True)
        jax.block_until_ready(out)
        ref = _reference(x2, w2, b2, fn_inside=fi)
        assert jnp.allclose(out, ref, atol=1e-4, rtol=1e-4), f"tiled fi={fi}"

    print("KERNEL_OK")
</pallas_src>

<mosaic_0001>
module attributes {stable_mosaic.version = 11 : i64} {
  func.func @kernel(%arg0: i32, %arg1: memref<8x128xf32, #tpu.memory_space<vmem>>, %arg2: memref<128x128xf32, #tpu.memory_space<vmem>>, %arg3: memref<1x128xf32, #tpu.memory_space<vmem>>, %arg4: memref<8x128xf32, #tpu.memory_space<vmem>>) attributes {dimension_semantics = [#tpu.dimension_semantics<parallel>], iteration_bounds = array<i64: 2>, scalar_prefetch = 0 : i64, scratch_operands = 0 : i64, tpu.core_type = #tpu.core_type<tc>, window_params = [{transform_indices = @transform_0, window_bounds = array<i64: 8, 128>}, {pipeline_mode = #tpu.pipeline_mode<synchronous>, transform_indices = @transform_1, window_bounds = array<i64: 128, 128>}, {pipeline_mode = #tpu.pipeline_mode<synchronous>, transform_indices = @transform_2, window_bounds = array<i64: 1, 128>}, {transform_indices = @transform_3, window_bounds = array<i64: 8, 128>}]} {
    %c0 = arith.constant 0 : index
    %c0_0 = arith.constant 0 : index
    %0 = vector.load %arg1[%c0, %c0_0] : memref<8x128xf32, #tpu.memory_space<vmem>>, vector<8x128xf32>
    %c0_1 = arith.constant 0 : index
    %c0_2 = arith.constant 0 : index
    %1 = vector.load %arg2[%c0_1, %c0_2] : memref<128x128xf32, #tpu.memory_space<vmem>>, vector<128x128xf32>
    %cst = arith.constant dense<0.000000e+00> : vector<8x128xf32>
    %2 = tpu.matmul %0, %1, %cst {dimension_numbers = #tpu.dot_dimension_numbers<[1], [1], [0], [0], [0, 0, 1, 0], [], []>} : vector<8x128xf32>, vector<128x128xf32>, vector<8x128xf32> -> vector<8x128xf32>
    %c0_3 = arith.constant 0 : index
    %c0_4 = arith.constant 0 : index
    %3 = vector.load %arg3[%c0_3, %c0_4] : memref<1x128xf32, #tpu.memory_space<vmem>>, vector<1x128xf32>
    %4 = vector.broadcast %3 : vector<1x128xf32> to vector<8x128xf32>
    %5 = arith.addf %2, %4 : vector<8x128xf32>
    %6 = math.tanh %5 : vector<8x128xf32>
    %c0_5 = arith.constant 0 : index
    %c0_6 = arith.constant 0 : index
    %7 = vector.load %arg4[%c0_5, %c0_6] : memref<8x128xf32, #tpu.memory_space<vmem>>, vector<8x128xf32>
    tpu.vector_store %arg4[%c0_5, %c0_6], %6 {strides = array<i32>} : memref<8x128xf32, #tpu.memory_space<vmem>>, vector<8x128xf32>,
    return
  }
  func.func @transform_0(%arg0: i32) -> (i32, i32) {
    %c0_i32 = arith.constant 0 : i32
    %c0_i32_0 = arith.constant 0 : i32
    return %arg0, %c0_i32 : i32, i32
  }
  func.func @transform_1(%arg0: i32) -> (i32, i32) {
    %c0_i32 = arith.constant 0 : i32
    %c0_i32_0 = arith.constant 0 : i32
    %c0_i32_1 = arith.constant 0 : i32
    return %c0_i32, %c0_i32_0 : i32, i32
  }
  func.func @transform_2(%arg0: i32) -> (i32, i32) {
    %c0_i32 = arith.constant 0 : i32
    %c0_i32_0 = arith.constant 0 : i32
    %c0_i32_1 = arith.constant 0 : i32
    return %c0_i32, %c0_i32_0 : i32, i32
  }
  func.func @transform_3(%arg0: i32) -> (i32, i32) {
    %c0_i32 = arith.constant 0 : i32
    %c0_i32_0 = arith.constant 0 : i32
    return %arg0, %c0_i32 : i32, i32
  }
}

</mosaic_0001>

<bundles_post_ra>
// kernel: forward_wrapper.1
= control target key start
LH: loop header
LB: loop body
LE: loop exit
PB: predicated region body
PF: predicated region fallthrough
CT: control target
= control target key end

     0   :  { %8 = vsyncpa [#allocation3], 0  ;;  %s556_s0 = inlined_call_operand.vmem [shape: f32[16,128], index: 0, kind: input, shape index: {}]   ;;  %s557_s1 = inlined_call_operand.vmem [shape: f32[128,128], index: 1, kind: input, shape index: {}]   ;;  %s558_s2 = inlined_call_operand.vmem [shape: f32[1,128], index: 2, kind: input, shape index: {}]   ;;  %s559_s3 = inlined_call_operand.hbm [shape: f32[16,128], index: 3, kind: output, shape index: {}]  }
   0x1   :  { %10 = vsyncpa [#allocation3 + $0x1], 0  ;;  %s420_s12 = smov 0   ;;  %s422_s13 = smov 0  }
   0x2   :  { %s424_s14 = smov 0   ;;  %s426_s15 = smov 0  }
   0x3 LB: > { %s441_s16 = sadd.s32 4294967295, %s398_s15   ;;  %s284_s17 = sadd.s32 4294967294, %s398_s15   ;;  %s398_s15 = sphi %s426_s15, %s565_s15   ;;  %s394_s14 = sphi %s424_s14, %s564_s14   ;;  %s390_s13 = sphi %s422_s13, %s563_s13   ;;  %s386_s12 = sphi %s420_s12, %s562_s12  }
   0x4   : > { %s445_s18 = sadd.s32 1, %s398_s15   ;;  %s91_s19 = sadd.s32 1, %s394_s14 }
   0x5   : > { %s88_s20 = ssub.s32 %s398_s15, %s445_s18  ;;  %p101_p0 = scmp.ne.s32.totalorder %s394_s14, %s390_s13 }
   0x6   : > { %p89_p1 = scmp.eq.s32.totalorder %s88_s20, 0  ;;  %p102_p2 = scmp.eq.s32.totalorder %s441_s16, 1 }
   0x7   : > { %p107_p3 = scmp.ne.s32.totalorder %s390_s13, %s386_s12  ;;  %p108_p4 = scmp.eq.s32.totalorder %s284_s17, 1 }
   0x8   : > { %s456_s21 = scalar_select %p89_p1, %s394_s14, %s91_s19  }
   0x9   : > { %p458_p5 = por %p102_p2, %p101_p0  ;;  %p462_p6 = por %p108_p4, %p107_p3 }
   0xa   : > { %p287_p7 = scmp.ge.s32.totalorder %s398_s15, 1  ;;  %p139_p8 = scmp.lt.s32.totalorder %s398_s15, 3 }
   0xc   : > { %p140_p9 = pnand %p287_p7, %p139_p8 }
   0xd   : > { %p162_p10 = scmp.lt.s32.totalorder (!%p140_p9), %s441_s16, 1  ;;  %s159_s25 = sand.u32 (!%p140_p9), 1, %s390_s13  }
   0xe   : > { %143 = sbr.rel (%p140_p9) target bundleno = 221 (0xdd), region = 32  ;;  %s288_s28 = sshll.u32 (!%p140_p9), %s159_s25, 3 }
   0xf   : > { %s291_s29 = sshll.u32 (!%p140_p9), %s441_s16, 3  ;;  %s161_s6 = scalar_lea.vmem (!%p140_p9), [#allocation2], %s288_s28 }
  0x10   : > { %s220_s5 = scalar_lea.hbm (!%p140_p9), %s559_s3, %s291_s29  ;;  %s210_s9 = scalar_lea.sflag (!%p140_p9), [#allocation3], %s159_s25 }
  0x11   : > { %s224_s8 = sshll.u32 (!%p140_p9), %s220_s5, 4  ;;  %s356_s19 = scalar_lea.hbm (!%p140_p9), %s559_s3, 16  ;;  %s225_s8 = int_to_ptr.hbm [resolvable:$true] %s224_s8 }
  0x13   : > { %v182_v0 = vld [vmem:[%s557_s1 + $0x78] sm:$0xff]  ;;  %v181_v1 = vld [vmem:[%s557_s1 + $0x70] sm:$0xff]  ;;  %v180_v2 = vld [vmem:[%s557_s1 + $0x68] sm:$0xff]  ;;  %s163_s7 = scalar_select %p162_p10, %s441_s16, 1 }
  0x14   : > { %187 = vmatpush.xpose.msra.mxu0 %v182_v0  ;;  %v179_v3 = vld [vmem:[%s557_s1 + $0x60] sm:$0xff]  ;;  %v178_v4 = vld [vmem:[%s557_s1 + $0x58] sm:$0xff]  ;;  %v177_v5 = vld [vmem:[%s557_s1 + $0x50] sm:$0xff] }
  0x15   : > { %v176_v6 = vld [vmem:[%s557_s1 + $0x48] sm:$0xff]  ;;  %v175_v7 = vld [vmem:[%s557_s1 + $0x40] sm:$0xff]  ;;  %v174_v8 = vld [vmem:[%s557_s1 + $0x38] sm:$0xff]  ;;  %s289_s10 = sshll.u32 %s163_s7, 3  ;;  %s222_s7 = sshll.u32 %s161_s6, 4  ;;  %s223_s7 = int_to_ptr.vmem [resolvable:$true] %s222_s7 }
  0x16   : > { %v173_v9 = vld [vmem:[%s557_s1 + $0x30] sm:$0xff]  ;;  %v172_v10 = vld [vmem:[%s557_s1 + $0x28] sm:$0xff]  ;;  %v171_v11 = vld [vmem:[%s557_s1 + $0x20] sm:$0xff]  ;;  %s165_s24 = scalar_lea.vmem %s556_s0, %s289_s10  ;;  %s350_s10 = sshra.s32 %s225_s8, 4  ;;  %s351_s10 = int_to_ptr.hbm [resolvable:$true] %s350_s10 }
  0x17   : > { %v170_v12 = vld [vmem:[%s557_s1 + $0x18] sm:$0xff]  ;;  %v169_v13 = vld [vmem:[%s557_s1 + $0x10] sm:$0xff]  ;;  %v168_v14 = vld [vmem:[%s557_s1 + $0x8] sm:$0xff]  ;;  %s352_s11 = scalar_lea.hbm %s351_s10, 8  ;;  %p357_p0 = scmp.lt.s32.totalorder %s351_s10, %s559_s3 }
  0x18   : > { %188 = vmatpush.xpose.msra.mxu0 %v181_v1  ;;  %v167_v15 = vld [vmem:[%s557_s1] sm:$0xff]  ;;  %p353_p11 = scmp.ne.s32.totalorder %s351_s10, %s352_s11  ;;  %p358_p1 = scmp.lt.s32.totalorder %s356_s19, %s352_s11 }
  0x19   : > { %v166_v16 = vld [vmem:[%s165_s24] sm:$0xff] }
  0x1a   : > { %v333_v17 = vld [vmem:[%s558_s2] ss:$0 sm:$0xff]  ;;  %p354_p12 = pnand %p353_p11, %p458_p5  ;;  %p359_p2 = por %p358_p1, %p357_p0 }
  0x1c   : > { %189 = vmatpush.xpose.msra.mxu0 %v180_v2  ;;  %p355_p13 = pneg %p354_p12 }
  0x1e   : > { %p360_p3 = pnand %p359_p2, %p355_p13 }
  0x20   : > { %190 = vmatpush.xpose.msra.mxu0 %v179_v3 }
  0x24   : > { %191 = vmatpush.xpose.msra.mxu0 %v178_v4 }
  0x28   : > { %192 = vmatpush.xpose.msra.mxu0 %v177_v5 }
  0x2c   : > { %193 = vmatpush.xpose.msra.mxu0 %v176_v6 }
  0x30   : > { %194 = vmatpush.xpose.msra.mxu0 %v175_v7 }
  0x34   : > { %195 = vmatpush.xpose.msra.mxu0 %v174_v8 }
  0x38   : > { %196 = vmatpush.xpose.msra.mxu0 %v173_v9 }
  0x3c   : > { %197 = vmatpush.xpose.msra.mxu0 %v172_v10 }
  0x40   : > { %198 = vmatpush.xpose.msra.mxu0 %v171_v11 }
  0x44   : > { %199 = vmatpush.xpose.msra.mxu0 %v170_v12 }
  0x48   : > { %200 = vmatpush.xpose.msra.mxu0 %v169_v13 }
  0x4c   : > { %201 = vmatpush.xpose.msra.mxu0 %v168_v14 }
  0x50   : > { %202 = vmatpush.xpose.msra.mxu0 %v167_v15 }
  0x53   : > { %203 = vmatmul.f32.vlgmr.msra.gmra.mxu0 %v166_v16 }
  0xd0   : > { %v204_v18 = vpop.f32.mrf.mxu0 }
  0xd1   : > { %v205_v19 = vadd.f32 %v333_v17, %v204_v18 }
  0xd3   : > { %334 = vtanh.f32 %v205_v19 }
  0xd9   : > { %v335_v20 = vpop.eup %334 }
  0xda   : > { %208 = vst [vmem:[%s161_s6] sm:$0xff] %v335_v20 }
  0xdb   : > { %363 = shalt.err (!%p360_p3)
}
  0xdc   : > { %294 = dma.vmem_to_hbm [thread:$0]  (%p458_p5), %s223_s7, 128, %s225_s8, %s210_s9  }
  0xdd PF: > { %p300_p4 = scmp.ge.s32.totalorder %s398_s15, 2  ;;  %s236_s25 = sand.u32 1, %s386_s12  }
  0xde   : > { %s237_s26 = scalar_lea.sflag [#allocation3], %s236_s25 }
  0xdf   : > { %p297_p7 = pnand %p300_p4, %p462_p6 }
  0xe1   : > { %p298_p8 = pneg %p297_p7 }
  0xe3   : > { %381 = dma.done.wait (%p298_p8), %s237_s26, 128  }
  0xe4   : > { %383 = vsyncadd (%p298_p8), %s237_s26, 4294967168  ;;  %p13_p9 = scmp.ge.s32.totalorder %s445_s18, 4   ;;  %s562_s12 = smov %s390_s13 }
  0xe5   : > { %s563_s13 = smov %s394_s14  ;;  %s564_s14 = smov %s456_s21 }
  0xe6   : > { %s565_s15 = smov %s445_s18  ;;  %15 = sbr.rel (!%p13_p9) target bundleno = 3 (0x3), region = 67 }
  0xeb   :  { %243 = vsyncpa [#allocation3], 1 }
  0xec   :  { %245 = vsyncpa [#allocation3 + $0x1], 1 }

</bundles_post_ra>
